<compile_context>
chip_gen: v6e
topology: v6e:2x2x1
jax: 0.10.0
libtpu: 0.0.40
codegen_flags: <defaults>
</compile_context>

<pallas_src>
import jax
import jax.numpy as jnp
from jax.experimental import pallas as pl
from jax.experimental.pallas import tpu as pltpu


# -----------------------------------------------------------------------------
# pe table (identical math to the PyTorch __init__)
# -----------------------------------------------------------------------------
def make_positional_encoding_table(dim: int, len_max: int) -> jnp.ndarray:
    div = jnp.exp(-jnp.arange(0.0, dim, 2, dtype=jnp.float32) / dim
                  * jnp.log(jnp.float32(10000.0)))[:, None]          # (dim//2, 1)
    l_pos = jnp.arange(0.0, len_max, dtype=jnp.float32)               # (len_max,)
    angles = l_pos[None, :] * div                                     # (dim//2, len_max)
    pe = jnp.zeros((1, dim, len_max), dtype=jnp.float32)
    pe = pe.at[:, 0::2, :].set(jnp.sin(angles)[None])
    pe = pe.at[:, 1::2, :].set(jnp.cos(angles)[None])
    return pe


# -----------------------------------------------------------------------------
# VMEM-aware tile sizing helpers
# -----------------------------------------------------------------------------
def _vmem_capacity_bytes() -> int:
    try:
        return int(pltpu.get_tpu_info().vmem_capacity_bytes)
    except Exception:
        return 64 << 20          # v7x per-TC VMEM -- the binding case


def _tile(n: int, unit: int, cap_elems: int) -> int:
    """Block size along one sublane/lane dim: the full dim if it fits the
    element budget, else the largest legal multiple of `unit` under it."""
    cap_elems = max(cap_elems, unit)
    if n <= cap_elems:
        return n                                 # full dim is always legal
    return min(n, (cap_elems // unit) * unit)    # multiple of `unit`, < n


# -----------------------------------------------------------------------------
# Path 1: python-int start  ->  lane/sublane-dense tiled broadcast add
# -----------------------------------------------------------------------------
def _add_bcast_kernel(x_ref, pe_ref, o_ref):
    # x_ref: (TB, TC, TL)   pe_ref: (1, TC, TL)   o_ref: (TB, TC, TL)
    o_ref[...] = (x_ref[...] + pe_ref[...]).astype(o_ref.dtype)


@jax.jit
def _pos_enc_static(x, pe_win):
    # x: (B, C, L); pe_win: (1, C, L), already start-sliced and cast to x.dtype.
    B, C, L = x.shape
    itemsize = x.dtype.itemsize
    vmem_cap = _vmem_capacity_bytes()

    # ~4-8 MiB x blocks; shrink on VMEM-poor generations (v7x 64 MiB -> 4 MiB).
    target = max(256 << 10, min(8 << 20, vmem_cap // 16))
    TL = _tile(L, 128, target // (8 * itemsize))              # lane-dense first
    TC = _tile(C, 8, max(8, target // (TL * itemsize)))       # then sublane-dense
    TB = max(1, min(B, target // (TC * TL * itemsize)))

    gc, gl, gb = pl.cdiv(C, TC), pl.cdiv(L, TL), pl.cdiv(B, TB)
    # Never leave a large problem as one block: v7x has 2 TensorCores per chip.
    if gc == 1 and gl == 1 and gb == 1 and B >= 2 and B * C * L * itemsize > (2 << 20):
        TB = pl.cdiv(B, 2)
        gb = pl.cdiv(B, TB)

    # Double-buffered x + out blocks plus the resident pe window, with headroom.
    need = (4 * TB + 2) * TC * TL * itemsize + (1 << 20)
    vmem_limit = int(min(vmem_cap, max(32 << 20, need)))

    cost = pl.CostEstimate(flops=B * C * L, transcendentals=0,
                           bytes_accessed=(2 * B + 1) * C * L * itemsize)

    return pl.pallas_call(
        _add_bcast_kernel,
        out_shape=jax.ShapeDtypeStruct((B, C, L), x.dtype),
        # Batch-tile axis innermost: pe block index is constant across it, so
        # the pe window is DMA'd once per (C, L) tile, not once per step.
        grid=(gc, gl, gb),
        in_specs=[
            pl.BlockSpec((TB, TC, TL), lambda i, j, b: (b, i, j)),   # x
            pl.BlockSpec((1, TC, TL), lambda i, j, b: (0, i, j)),    # pe window
        ],
        out_specs=pl.BlockSpec((TB, TC, TL), lambda i, j, b: (b, i, j)),
        compiler_params=pltpu.CompilerParams(
            dimension_semantics=("parallel", "parallel", "parallel"),
            vmem_limit_bytes=vmem_limit),
        cost_estimate=cost,
    )(x, pe_win)


# -----------------------------------------------------------------------------
# Path 2: per-batch start array  ->  double-buffered (C, L) pe-window DMA
# -----------------------------------------------------------------------------
def _pos_enc_window_kernel(starts_ref, x_ref, pe_hbm, o_ref, pe_buf, sems):
    # starts_ref: SMEM (B,) int32 (scalar-prefetched)
    # x_ref / o_ref: VMEM (1, C, L)    pe_hbm: HBM (C, len_max)
    # pe_buf: VMEM (2, C, L) double buffer    sems: DMA semaphores (2,)
    b = pl.program_id(0)
    nb = pl.num_programs(0)
    L = x_ref.shape[-1]
    len_max = pe_hbm.shape[-1]
    slot = jax.lax.rem(b, 2)

    def window_copy(batch_idx, slot_idx):
        # Clamp so an out-of-range start can never DMA out of bounds.
        s = jnp.clip(starts_ref[batch_idx], 0, len_max - L)
        return pltpu.make_async_copy(pe_hbm.at[:, pl.ds(s, L)],
                                     pe_buf.at[slot_idx], sems.at[slot_idx])

    @pl.when(b == 0)
    def _():
        window_copy(0, 0).start()              # warm-up: first batch's window

    @pl.when(b + 1 < nb)
    def _():
        window_copy(b + 1, 1 - slot).start()   # prefetch next batch's window

    window_copy(b, slot).wait()
    o_ref[...] = (x_ref[...] + pe_buf[slot][None]).astype(o_ref.dtype)


@jax.jit
def _pos_enc_dynamic(x, pe2d, starts):
    # TODO(synk): if a single (C, L) window ever exceeds VMEM, tile the window
    # DMA over L as well; current production shapes (dim<=1024, L<=4096) fit.
    B, C, L = x.shape
    itemsize = x.dtype.itemsize
    vmem_cap = _vmem_capacity_bytes()
    need = 6 * C * L * itemsize + (1 << 20)    # 2x(x)+2x(out)+2x(pe window)
    vmem_limit = int(min(vmem_cap, max(32 << 20, need)))
    cost = pl.CostEstimate(flops=B * C * L, transcendentals=0,
                           bytes_accessed=3 * B * C * L * itemsize)

    grid_spec = pltpu.PrefetchScalarGridSpec(
        num_scalar_prefetch=1,
        grid=(B,),
        in_specs=[
            pl.BlockSpec((1, C, L), lambda b, starts: (b, 0, 0)),   # x
            pl.BlockSpec(memory_space=pl.ANY),                      # pe stays in HBM
        ],
        out_specs=pl.BlockSpec((1, C, L), lambda b, starts: (b, 0, 0)),
        scratch_shapes=[
            pltpu.VMEM((2, C, L), pe2d.dtype),
            pltpu.SemaphoreType.DMA((2,)),
        ],
    )
    return pl.pallas_call(
        _pos_enc_window_kernel,
        out_shape=jax.ShapeDtypeStruct((B, C, L), x.dtype),
        grid_spec=grid_spec,
        # "arbitrary": the cross-iteration pe prefetch chain needs the grid to
        # run sequentially in order (a split across v7x cores would break the
        # warm-up step of the double buffer).
        compiler_params=pltpu.CompilerParams(
            dimension_semantics=("arbitrary",),
            vmem_limit_bytes=vmem_limit),
        cost_estimate=cost,
    )(starts, x, pe2d)


# -----------------------------------------------------------------------------
# Wrapper matching PositionalEncoding1D.forward
# -----------------------------------------------------------------------------
def positional_encoding_1d_apply(x, pe, start):
    """x: (B, C, L); pe: (1, C, len_max); start: python int or length-B int array."""
    B, C, L = x.shape
    len_max = pe.shape[-1]
    if L > len_max:
        raise ValueError("sequence length exceeds len_max")
    if pe.dtype != x.dtype:
        # Pre-cast once (HBM-bandwidth win for bf16 x).  See dtype note at top.
        pe = pe.astype(x.dtype)
    if isinstance(start, int):
        if start < 0 or start + L > len_max:
            raise ValueError("start out of range")
        pe_win = pe[:, :, start:start + L]          # static slice in the wrapper
        return _pos_enc_static(x, pe_win)
    starts = jnp.asarray(start, dtype=jnp.int32).reshape((B,))
    return _pos_enc_dynamic(x, pe.reshape(C, len_max), starts)


# -----------------------------------------------------------------------------
# Pure-JAX reference (mirrors the PyTorch forward)
# -----------------------------------------------------------------------------
def _reference(x, pe, start):
    B, C, L = x.shape
    if isinstance(start, int):
        return x + pe[:, :, start:start + L]
    return jnp.stack(
        [x[i] + pe[0, :, int(start[i]):int(start[i]) + L] for i in range(B)], axis=0)


if __name__ == "__main__":
    key = jax.random.PRNGKey(0)

    B, C, L = 2, 8, 16          # dim = C = 8 (even), sequence length 16
    len_max = 32

    pe = make_positional_encoding_table(dim=C, len_max=len_max)
    x = jax.random.normal(key, (B, C, L), dtype=jnp.float32)

    # Case 1: integer start (shared across the batch) -> static-slice fast path
    out_int = positional_encoding_1d_apply(x, pe, 3)
    jax.block_until_ready(out_int)
    assert out_int.shape == (B, C, L)
    assert jnp.allclose(out_int, _reference(x, pe, 3), atol=1e-6), "int-start mismatch"

    # Case 2: per-batch start indices -> scalar-prefetch + double-buffered window DMA
    starts = jnp.array([0, 7], dtype=jnp.int32)
    out_vec = positional_encoding_1d_apply(x, pe, starts)
    jax.block_until_ready(out_vec)
    assert out_vec.shape == (B, C, L)
    assert jnp.allclose(out_vec, _reference(x, pe, starts), atol=1e-6), "vector-start mismatch"

    print("KERNEL_OK")
</pallas_src>

<mosaic_0001>
module attributes {stable_mosaic.version = 11 : i64} {
  func.func @_add_bcast_kernel(%arg0: i32, %arg1: i32, %arg2: i32, %arg3: memref<2x8x16xf32, #tpu.memory_space<vmem>>, %arg4: memref<1x8x16xf32, #tpu.memory_space<vmem>>, %arg5: memref<2x8x16xf32, #tpu.memory_space<vmem>>) attributes {dimension_semantics = [#tpu.dimension_semantics<parallel>, #tpu.dimension_semantics<parallel>, #tpu.dimension_semantics<parallel>], iteration_bounds = array<i64: 1, 1, 1>, scalar_prefetch = 0 : i64, scratch_operands = 0 : i64, tpu.core_type = #tpu.core_type<tc>, window_params = [{transform_indices = @transform_0, window_bounds = array<i64: 2, 8, 16>}, {transform_indices = @transform_1, window_bounds = array<i64: 1, 8, 16>}, {transform_indices = @transform_2, window_bounds = array<i64: 2, 8, 16>}]} {
    %c0 = arith.constant 0 : index
    %c0_0 = arith.constant 0 : index
    %c0_1 = arith.constant 0 : index
    %0 = vector.load %arg3[%c0, %c0_0, %c0_1] : memref<2x8x16xf32, #tpu.memory_space<vmem>>, vector<2x8x16xf32>
    %c0_2 = arith.constant 0 : index
    %c0_3 = arith.constant 0 : index
    %c0_4 = arith.constant 0 : index
    %1 = vector.load %arg4[%c0_2, %c0_3, %c0_4] : memref<1x8x16xf32, #tpu.memory_space<vmem>>, vector<1x8x16xf32>
    %2 = vector.broadcast %1 : vector<1x8x16xf32> to vector<2x8x16xf32>
    %3 = arith.addf %0, %2 : vector<2x8x16xf32>
    %c0_5 = arith.constant 0 : index
    %c0_6 = arith.constant 0 : index
    %c0_7 = arith.constant 0 : index
    %4 = vector.load %arg5[%c0_5, %c0_6, %c0_7] : memref<2x8x16xf32, #tpu.memory_space<vmem>>, vector<2x8x16xf32>
    tpu.vector_store %arg5[%c0_5, %c0_6, %c0_7], %3 {strides = array<i32>} : memref<2x8x16xf32, #tpu.memory_space<vmem>>, vector<2x8x16xf32>,
    return
  }
  func.func @transform_0(%arg0: i32, %arg1: i32, %arg2: i32) -> (i32, i32, i32) {
    %c0_i32 = arith.constant 0 : i32
    return %arg2, %arg0, %arg1 : i32, i32, i32
  }
  func.func @transform_1(%arg0: i32, %arg1: i32, %arg2: i32) -> (i32, i32, i32) {
    %c0_i32 = arith.constant 0 : i32
    %c0_i32_0 = arith.constant 0 : i32
    return %c0_i32, %arg0, %arg1 : i32, i32, i32
  }
  func.func @transform_2(%arg0: i32, %arg1: i32, %arg2: i32) -> (i32, i32, i32) {
    %c0_i32 = arith.constant 0 : i32
    return %arg2, %arg0, %arg1 : i32, i32, i32
  }
}

</mosaic_0001>

<bundles_post_ra>
// kernel: _pos_enc_static.1
= control target key start
LH: loop header
LB: loop body
LE: loop exit
PB: predicated region body
PF: predicated region fallthrough
CT: control target
= control target key end

     0   :  { %7 = vsyncpa [#allocation3], 0  ;;  %s170_s0 = inlined_call_operand.hbm [shape: f32[2,8,16], index: 0, kind: input, shape index: {}]   ;;  %s171_s1 = inlined_call_operand.hbm [shape: f32[1,8,16], index: 1, kind: input, shape index: {}]   ;;  %s172_s2 = inlined_call_operand.hbm [shape: f32[2,8,16], index: 2, kind: output, shape index: {}]  }
   0x1   :  { %8 = vsyncpa [#allocation6], 0 }
   0x2   :  { %9 = vsyncpa [#allocation4], 0  ;;  %s135_s9 = smov [#allocation2]  }
   0x3   :  { %s15_s10 = sshll.u32 %s135_s9, 4  ;;  %s16_s10 = int_to_ptr.vmem [resolvable:$true] %s15_s10 }
   0x4   :  { %s77_s11 = scalar_lea.vmem %s16_s10, 256  ;;  %p82_p1 = scmp.lt.s32.totalorder %s16_s10, %s16_s10 }
   0x5   :  { %p78_p0 = scmp.ne.s32.totalorder %s16_s10, %s77_s11  ;;  %p83_p2 = scmp.lt.s32.totalorder %s77_s11, %s77_s11 }
   0x7   :  { %p84_p3 = por %p83_p2, %p82_p1 }
   0x9   :  { %p85_p4 = pnand %p84_p3, %p78_p0 }
   0xb   :  { %88 = shalt.err (!%p85_p4)
}
   0xc   :  { %s136_s12 = smov 128   ;;  %s137_s13 = smov 8  }
   0xd   :  { %21 = dma.hbm_to_vmem [thread:$0]  %s170_s0, 256, %s16_s10, [#allocation3], %s136_s12, %s136_s12, %s137_s13  }
   0xe   :  { %s138_s16 = smov [#allocation5]  }
   0xf   :  { %s28_s17 = sshll.u32 %s138_s16, 4  ;;  %s29_s17 = int_to_ptr.vmem [resolvable:$true] %s28_s17 }
  0x10   :  { %s97_s18 = scalar_lea.vmem %s29_s17, 128  ;;  %p102_p6 = scmp.lt.s32.totalorder %s29_s17, %s29_s17 }
  0x11   :  { %p98_p5 = scmp.ne.s32.totalorder %s29_s17, %s97_s18  ;;  %p103_p7 = scmp.lt.s32.totalorder %s97_s18, %s97_s18 }
  0x13   :  { %p104_p8 = por %p103_p7, %p102_p6 }
  0x15   :  { %p105_p9 = pnand %p104_p8, %p98_p5 }
  0x17   :  { %108 = shalt.err (!%p105_p9)
}
  0x18   :  { %31 = dma.hbm_to_vmem [thread:$0]  %s171_s1, 128, %s29_s17, [#allocation6]  }
  0x19   :  { %129 = dma.done.wait [#allocation3], 256  }
  0x1a   :  { %130 = vsyncadd [#allocation3], 4294967040 }
  0x1b   :  { %131 = dma.done.wait [#allocation6], 128  }
  0x1c   :  { %132 = vsyncadd [#allocation6], 4294967168  ;;  %s139_s21 = smov [#allocation7]   ;;  %v38_v0 = vld [vmem:[#allocation2] sm:$0xff]  ;;  %v40_v1 = vld [vmem:[#allocation5] sm:$0xff]  ;;  %vm43_vm0 = vcmask 130048  }
  0x1d   :  { %s51_s0 = sshll.u32 %s139_s21, 4  ;;  %v39_v2 = vld [vmem:[#allocation2 + $0x8] sm:$0xff]  ;;  %v41_v3 = vadd.f32 %v40_v1, %v38_v0  ;;  %s52_s0 = int_to_ptr.vmem [resolvable:$true] %s51_s0 }
  0x1e   :  { %v42_v4 = vadd.f32 %v40_v1, %v39_v2  ;;  %s109_s22 = scalar_lea.vmem %s52_s0, 256  ;;  %p114_p11 = scmp.lt.s32.totalorder %s52_s0, %s52_s0 }
  0x1f   :  { %44 = vst.msk [vmem:[#allocation7] sm:$0xff] %vm43_vm0, %v41_v3  ;;  %p110_p10 = scmp.ne.s32.totalorder %s52_s0, %s109_s22  ;;  %p115_p12 = scmp.lt.s32.totalorder %s109_s22, %s109_s22 }
  0x20   :  { %45 = vst.msk [vmem:[#allocation7 + $0x8] sm:$0xff] %vm43_vm0, %v42_v4 }
  0x21   :  { %p116_p13 = por %p115_p12, %p114_p11 }
  0x23   :  { %p117_p0 = pnand %p116_p13, %p110_p10 }
  0x25   :  { %120 = shalt.err (!%p117_p0)
}
  0x26   :  { %57 = dma.vmem_to_hbm [thread:$0]  %s52_s0, 256, %s172_s2, [#allocation4], %s136_s12, %s136_s12, %s137_s13  }
  0x27   :  { %133 = dma.done.wait [#allocation4], 256  }
  0x28   :  { %134 = vsyncadd [#allocation4], 4294967040 }
  0x29   :  { %61 = vsyncpa [#allocation3], 1 }
  0x2a   :  { %62 = vsyncpa [#allocation6], 1 }
  0x2b   :  { %63 = vsyncpa [#allocation4], 1 }

</bundles_post_ra>
